<compile_context>
chip_gen: v7x
topology: tpu7x:2x2x1
jax: 0.10.0
libtpu: 0.0.40
codegen_flags: <defaults>
</compile_context>

<pallas_src>
import functools

import jax
import jax.numpy as jnp
from jax import lax
from jax.experimental import pallas as pl
from jax.experimental.pallas import tpu as pltpu


def _round_up(x, m):
    return (x + m - 1) // m * m


def _keep_mask(shape, base_row, seed_scalar, drop_threshold_31):
    """Counter-based hash PRNG -> boolean keep mask (True = keep).

    Uses the murmur3 fmix32 finalizer on the *global* element coordinate so
    the random stream does not depend on how tokens are tiled across the grid.
    """
    rows = lax.broadcasted_iota(jnp.int32, shape, 0) + base_row        # (T, D)
    cols = lax.broadcasted_iota(jnp.int32, shape, 1)                   # (T, D)
    h = (rows * jnp.int32(shape[1]) + cols).astype(jnp.uint32)
    h = h ^ (seed_scalar.astype(jnp.uint32) * jnp.uint32(0x9E3779B9))
    # murmur3 fmix32 — good avalanche for sequential counters.
    h = h ^ (h >> jnp.uint32(16))
    h = h * jnp.uint32(0x85EBCA6B)
    h = h ^ (h >> jnp.uint32(13))
    h = h * jnp.uint32(0xC2B2AE35)
    h = h ^ (h >> jnp.uint32(16))
    # Compare in the non-negative int31 range (avoids unsigned-compare corners).
    bits31 = (h >> jnp.uint32(1)).astype(jnp.int32)                    # [0, 2^31)
    return bits31 >= jnp.int32(drop_threshold_31)


# ----------------------------- kernel ----------------------------------------

def _embedding_kernel(idx_ref, seed_ref, w_ref, o_ref, *,
                      tokens_per_tile, dropout_p, apply_dropout):
    # idx_ref : (N_pad,) int32 in SMEM (scalar prefetch)
    # seed_ref: (1,)     int32 in SMEM (scalar prefetch)
    # w_ref   : (V, D)   VMEM-resident embedding table
    # o_ref   : (tokens_per_tile, D) output tile
    t = pl.program_id(0)
    base = t * tokens_per_tile

    def gather_row(s, carry):
        tok = idx_ref[base + s]                       # scalar read from SMEM
        o_ref[pl.ds(s, 1), :] = w_ref[pl.ds(tok, 1), :]   # (1, D) VMEM row copy
        return carry

    lax.fori_loop(0, tokens_per_tile, gather_row, 0,
                  unroll=True if tokens_per_tile <= 64 else 8)

    if apply_dropout:
        tile = o_ref[...]                                           # (T, D)
        thresh = min(int(float(dropout_p) * 2147483648.0), 2147483647)
        keep = _keep_mask(tile.shape, base, seed_ref[0], thresh)
        scale = jnp.float32(1.0 / (1.0 - float(dropout_p)))
        # scale folded into the select: one VPU mul + one select on the tile.
        o_ref[...] = jnp.where(keep, tile * scale,
                               jnp.float32(0.0)).astype(o_ref.dtype)


# ----------------------------- wrapper ----------------------------------------

def embedding_forward(x, weight, *, dropout=0.0, training=False, seed=0):
    """Equivalent of Embedding.forward: weight[x] followed by dropout."""
    B, S = x.shape
    V, D = weight.shape
    N = B * S

    # Flatten tokens and pick a large, sublane-aligned token tile.
    max_tile = 256
    n_pad = _round_up(N, 8)
    if n_pad <= max_tile:
        tile = n_pad
    else:
        tile = max_tile
        n_pad = _round_up(N, tile)
    num_tiles = n_pad // tile

    idx = jnp.zeros((n_pad,), jnp.int32).at[:N].set(
        x.reshape(-1).astype(jnp.int32))
    seed_arr = jnp.asarray([seed], dtype=jnp.int32)

    apply_dropout = bool(training) and float(dropout) > 0.0

    kernel = functools.partial(
        _embedding_kernel,
        tokens_per_tile=tile,
        dropout_p=float(dropout),
        apply_dropout=apply_dropout,
    )

    grid_spec = pltpu.PrefetchScalarGridSpec(
        num_scalar_prefetch=2,            # (token ids, seed) -> SMEM
        grid=(num_tiles,),
        in_specs=[
            # Full table resident in VMEM; constant index_map => fetched once.
            pl.BlockSpec((V, D), lambda t, idx_s, seed_s: (0, 0)),
        ],
        out_specs=pl.BlockSpec((tile, D), lambda t, idx_s, seed_s: (t, 0)),
    )

    out = pl.pallas_call(
        kernel,
        out_shape=jax.ShapeDtypeStruct((n_pad, D), weight.dtype),
        grid_spec=grid_spec,
        compiler_params=pltpu.CompilerParams(
            dimension_semantics=("parallel",)),
    )(idx, seed_arr, weight)

    return out[:N].reshape(B, S, D)


# ----------------------------- main -------------------------------------------

if __name__ == "__main__":
    VOCAB, DIM = 32, 128
    B, S = 2, 8
    DROPOUT_P = 0.25
    PAD_IDX = 0

    key = jax.random.PRNGKey(0)
    kw, kx = jax.random.split(key)

    # nn.Embedding init: N(0, 1), with the padding_idx row zeroed.
    weight = jax.random.normal(kw, (VOCAB, DIM), dtype=jnp.float32)
    weight = weight.at[PAD_IDX].set(0.0)

    x = jax.random.randint(kx, (B, S), 0, VOCAB, dtype=jnp.int32)
    x = x.at[0, 0].set(PAD_IDX)  # exercise the padding row

    # Pure-JAX reference for the embedding lookup.
    ref = jnp.take(weight, x, axis=0)                      # (B, S, D)

    # Eval mode (dropout is identity) -> must match the reference.
    out_eval = embedding_forward(x, weight, dropout=DROPOUT_P, training=False)
    out_eval = jax.block_until_ready(out_eval)
    assert out_eval.shape == (B, S, DIM) and out_eval.dtype == jnp.float32
    assert jnp.allclose(out_eval, ref, atol=1e-6), "eval-mode mismatch"

    # Training mode: every element is either 0 (dropped) or ref / (1 - p).
    out_train = embedding_forward(x, weight, dropout=DROPOUT_P, training=True,
                                  seed=1234)
    out_train = jax.block_until_ready(out_train)
    scaled_ref = ref / (1.0 - DROPOUT_P)
    ok = jnp.all((out_train == 0.0) |
                 jnp.isclose(out_train, scaled_ref, rtol=1e-5, atol=1e-5))
    assert bool(ok), "training-mode dropout values inconsistent"

    # Loose statistical sanity check on the drop rate (expected ~= p).
    nonzero = scaled_ref != 0.0
    drop_rate = float(jnp.sum((out_train == 0.0) & nonzero) / jnp.sum(nonzero))
    assert 0.10 < drop_rate < 0.40, f"drop rate {drop_rate} far from {DROPOUT_P}"

    print("KERNEL_OK")
</pallas_src>

<mosaic_0001>
module attributes {stable_mosaic.version = 11 : i64} {
  func.func @_embedding_kernel(%arg0: i32, %arg1: memref<16xi32, #tpu.memory_space<smem>>, %arg2: memref<1xi32, #tpu.memory_space<smem>>, %arg3: memref<32x128xf32, #tpu.memory_space<vmem>>, %arg4: memref<16x128xf32, #tpu.memory_space<vmem>>) attributes {dimension_semantics = [#tpu.dimension_semantics<parallel>], iteration_bounds = array<i64: 1>, scalar_prefetch = 2 : i64, scratch_operands = 0 : i64, tpu.core_type = #tpu.core_type<tc>, window_params = [{pipeline_mode = #tpu.pipeline_mode<synchronous>, transform_indices = @transform_0, window_bounds = array<i64: 32, 128>}, {transform_indices = @transform_1, window_bounds = array<i64: 16, 128>}]} {
    %c16_i32 = arith.constant 16 : i32
    %0 = arith.muli %arg0, %c16_i32 : i32
    %c0_i32 = arith.constant 0 : i32
    %1 = arith.addi %0, %c0_i32 : i32
    %2 = arith.index_cast %1 : i32 to index
    %3 = memref.load %arg1[%2] : memref<16xi32, #tpu.memory_space<smem>>
    %4 = arith.index_cast %3 : i32 to index
    %c0 = arith.constant 0 : index
    %5 = vector.load %arg3[%4, %c0] : memref<32x128xf32, #tpu.memory_space<vmem>>, vector<1x128xf32>
    %6 = arith.index_cast %c0_i32 : i32 to index
    %c0_0 = arith.constant 0 : index
    %7 = vector.load %arg4[%6, %c0_0] : memref<16x128xf32, #tpu.memory_space<vmem>>, vector<1x128xf32>
    tpu.vector_store %arg4[%6, %c0_0], %5 {strides = array<i32>} : memref<16x128xf32, #tpu.memory_space<vmem>>, vector<1x128xf32>,
    %c1_i32 = arith.constant 1 : i32
    %8 = arith.addi %0, %c1_i32 : i32
    %9 = arith.index_cast %8 : i32 to index
    %10 = memref.load %arg1[%9] : memref<16xi32, #tpu.memory_space<smem>>
    %11 = arith.index_cast %10 : i32 to index
    %c0_1 = arith.constant 0 : index
    %12 = vector.load %arg3[%11, %c0_1] : memref<32x128xf32, #tpu.memory_space<vmem>>, vector<1x128xf32>
    %13 = arith.index_cast %c1_i32 : i32 to index
    %c0_2 = arith.constant 0 : index
    %14 = vector.load %arg4[%13, %c0_2] : memref<16x128xf32, #tpu.memory_space<vmem>>, vector<1x128xf32>
    tpu.vector_store %arg4[%13, %c0_2], %12 {strides = array<i32>} : memref<16x128xf32, #tpu.memory_space<vmem>>, vector<1x128xf32>,
    %c2_i32 = arith.constant 2 : i32
    %15 = arith.addi %0, %c2_i32 : i32
    %16 = arith.index_cast %15 : i32 to index
    %17 = memref.load %arg1[%16] : memref<16xi32, #tpu.memory_space<smem>>
    %18 = arith.index_cast %17 : i32 to index
    %c0_3 = arith.constant 0 : index
    %19 = vector.load %arg3[%18, %c0_3] : memref<32x128xf32, #tpu.memory_space<vmem>>, vector<1x128xf32>
    %20 = arith.index_cast %c2_i32 : i32 to index
    %c0_4 = arith.constant 0 : index
    %21 = vector.load %arg4[%20, %c0_4] : memref<16x128xf32, #tpu.memory_space<vmem>>, vector<1x128xf32>
    tpu.vector_store %arg4[%20, %c0_4], %19 {strides = array<i32>} : memref<16x128xf32, #tpu.memory_space<vmem>>, vector<1x128xf32>,
    %c3_i32 = arith.constant 3 : i32
    %22 = arith.addi %0, %c3_i32 : i32
    %23 = arith.index_cast %22 : i32 to index
    %24 = memref.load %arg1[%23] : memref<16xi32, #tpu.memory_space<smem>>
    %25 = arith.index_cast %24 : i32 to index
    %c0_5 = arith.constant 0 : index
    %26 = vector.load %arg3[%25, %c0_5] : memref<32x128xf32, #tpu.memory_space<vmem>>, vector<1x128xf32>
    %27 = arith.index_cast %c3_i32 : i32 to index
    %c0_6 = arith.constant 0 : index
    %28 = vector.load %arg4[%27, %c0_6] : memref<16x128xf32, #tpu.memory_space<vmem>>, vector<1x128xf32>
    tpu.vector_store %arg4[%27, %c0_6], %26 {strides = array<i32>} : memref<16x128xf32, #tpu.memory_space<vmem>>, vector<1x128xf32>,
    %c4_i32 = arith.constant 4 : i32
    %29 = arith.addi %0, %c4_i32 : i32
    %30 = arith.index_cast %29 : i32 to index
    %31 = memref.load %arg1[%30] : memref<16xi32, #tpu.memory_space<smem>>
    %32 = arith.index_cast %31 : i32 to index
    %c0_7 = arith.constant 0 : index
    %33 = vector.load %arg3[%32, %c0_7] : memref<32x128xf32, #tpu.memory_space<vmem>>, vector<1x128xf32>
    %34 = arith.index_cast %c4_i32 : i32 to index
    %c0_8 = arith.constant 0 : index
    %35 = vector.load %arg4[%34, %c0_8] : memref<16x128xf32, #tpu.memory_space<vmem>>, vector<1x128xf32>
    tpu.vector_store %arg4[%34, %c0_8], %33 {strides = array<i32>} : memref<16x128xf32, #tpu.memory_space<vmem>>, vector<1x128xf32>,
    %c5_i32 = arith.constant 5 : i32
    %36 = arith.addi %0, %c5_i32 : i32
    %37 = arith.index_cast %36 : i32 to index
    %38 = memref.load %arg1[%37] : memref<16xi32, #tpu.memory_space<smem>>
    %39 = arith.index_cast %38 : i32 to index
    %c0_9 = arith.constant 0 : index
    %40 = vector.load %arg3[%39, %c0_9] : memref<32x128xf32, #tpu.memory_space<vmem>>, vector<1x128xf32>
    %41 = arith.index_cast %c5_i32 : i32 to index
    %c0_10 = arith.constant 0 : index
    %42 = vector.load %arg4[%41, %c0_10] : memref<16x128xf32, #tpu.memory_space<vmem>>, vector<1x128xf32>
    tpu.vector_store %arg4[%41, %c0_10], %40 {strides = array<i32>} : memref<16x128xf32, #tpu.memory_space<vmem>>, vector<1x128xf32>,
    %c6_i32 = arith.constant 6 : i32
    %43 = arith.addi %0, %c6_i32 : i32
    %44 = arith.index_cast %43 : i32 to index
    %45 = memref.load %arg1[%44] : memref<16xi32, #tpu.memory_space<smem>>
    %46 = arith.index_cast %45 : i32 to index
    %c0_11 = arith.constant 0 : index
    %47 = vector.load %arg3[%46, %c0_11] : memref<32x128xf32, #tpu.memory_space<vmem>>, vector<1x128xf32>
    %48 = arith.index_cast %c6_i32 : i32 to index
    %c0_12 = arith.constant 0 : index
    %49 = vector.load %arg4[%48, %c0_12] : memref<16x128xf32, #tpu.memory_space<vmem>>, vector<1x128xf32>
    tpu.vector_store %arg4[%48, %c0_12], %47 {strides = array<i32>} : memref<16x128xf32, #tpu.memory_space<vmem>>, vector<1x128xf32>,
    %c7_i32 = arith.constant 7 : i32
    %50 = arith.addi %0, %c7_i32 : i32
    %51 = arith.index_cast %50 : i32 to index
    %52 = memref.load %arg1[%51] : memref<16xi32, #tpu.memory_space<smem>>
    %53 = arith.index_cast %52 : i32 to index
    %c0_13 = arith.constant 0 : index
    %54 = vector.load %arg3[%53, %c0_13] : memref<32x128xf32, #tpu.memory_space<vmem>>, vector<1x128xf32>
    %55 = arith.index_cast %c7_i32 : i32 to index
    %c0_14 = arith.constant 0 : index
    %56 = vector.load %arg4[%55, %c0_14] : memref<16x128xf32, #tpu.memory_space<vmem>>, vector<1x128xf32>
    tpu.vector_store %arg4[%55, %c0_14], %54 {strides = array<i32>} : memref<16x128xf32, #tpu.memory_space<vmem>>, vector<1x128xf32>,
    %c8_i32 = arith.constant 8 : i32
    %57 = arith.addi %0, %c8_i32 : i32
    %58 = arith.index_cast %57 : i32 to index
    %59 = memref.load %arg1[%58] : memref<16xi32, #tpu.memory_space<smem>>
    %60 = arith.index_cast %59 : i32 to index
    %c0_15 = arith.constant 0 : index
    %61 = vector.load %arg3[%60, %c0_15] : memref<32x128xf32, #tpu.memory_space<vmem>>, vector<1x128xf32>
    %62 = arith.index_cast %c8_i32 : i32 to index
    %c0_16 = arith.constant 0 : index
    %63 = vector.load %arg4[%62, %c0_16] : memref<16x128xf32, #tpu.memory_space<vmem>>, vector<1x128xf32>
    tpu.vector_store %arg4[%62, %c0_16], %61 {strides = array<i32>} : memref<16x128xf32, #tpu.memory_space<vmem>>, vector<1x128xf32>,
    %c9_i32 = arith.constant 9 : i32
    %64 = arith.addi %0, %c9_i32 : i32
    %65 = arith.index_cast %64 : i32 to index
    %66 = memref.load %arg1[%65] : memref<16xi32, #tpu.memory_space<smem>>
    %67 = arith.index_cast %66 : i32 to index
    %c0_17 = arith.constant 0 : index
    %68 = vector.load %arg3[%67, %c0_17] : memref<32x128xf32, #tpu.memory_space<vmem>>, vector<1x128xf32>
    %69 = arith.index_cast %c9_i32 : i32 to index
    %c0_18 = arith.constant 0 : index
    %70 = vector.load %arg4[%69, %c0_18] : memref<16x128xf32, #tpu.memory_space<vmem>>, vector<1x128xf32>
    tpu.vector_store %arg4[%69, %c0_18], %68 {strides = array<i32>} : memref<16x128xf32, #tpu.memory_space<vmem>>, vector<1x128xf32>,
    %c10_i32 = arith.constant 10 : i32
    %71 = arith.addi %0, %c10_i32 : i32
    %72 = arith.index_cast %71 : i32 to index
    %73 = memref.load %arg1[%72] : memref<16xi32, #tpu.memory_space<smem>>
    %74 = arith.index_cast %73 : i32 to index
    %c0_19 = arith.constant 0 : index
    %75 = vector.load %arg3[%74, %c0_19] : memref<32x128xf32, #tpu.memory_space<vmem>>, vector<1x128xf32>
    %76 = arith.index_cast %c10_i32 : i32 to index
    %c0_20 = arith.constant 0 : index
    %77 = vector.load %arg4[%76, %c0_20] : memref<16x128xf32, #tpu.memory_space<vmem>>, vector<1x128xf32>
    tpu.vector_store %arg4[%76, %c0_20], %75 {strides = array<i32>} : memref<16x128xf32, #tpu.memory_space<vmem>>, vector<1x128xf32>,
    %c11_i32 = arith.constant 11 : i32
    %78 = arith.addi %0, %c11_i32 : i32
    %79 = arith.index_cast %78 : i32 to index
    %80 = memref.load %arg1[%79] : memref<16xi32, #tpu.memory_space<smem>>
    %81 = arith.index_cast %80 : i32 to index
    %c0_21 = arith.constant 0 : index
    %82 = vector.load %arg3[%81, %c0_21] : memref<32x128xf32, #tpu.memory_space<vmem>>, vector<1x128xf32>
    %83 = arith.index_cast %c11_i32 : i32 to index
    %c0_22 = arith.constant 0 : index
    %84 = vector.load %arg4[%83, %c0_22] : memref<16x128xf32, #tpu.memory_space<vmem>>, vector<1x128xf32>
    tpu.vector_store %arg4[%83, %c0_22], %82 {strides = array<i32>} : memref<16x128xf32, #tpu.memory_space<vmem>>, vector<1x128xf32>,
    %c12_i32 = arith.constant 12 : i32
    %85 = arith.addi %0, %c12_i32 : i32
    %86 = arith.index_cast %85 : i32 to index
    %87 = memref.load %arg1[%86] : memref<16xi32, #tpu.memory_space<smem>>
    %88 = arith.index_cast %87 : i32 to index
    %c0_23 = arith.constant 0 : index
    %89 = vector.load %arg3[%88, %c0_23] : memref<32x128xf32, #tpu.memory_space<vmem>>, vector<1x128xf32>
    %90 = arith.index_cast %c12_i32 : i32 to index
    %c0_24 = arith.constant 0 : index
    %91 = vector.load %arg4[%90, %c0_24] : memref<16x128xf32, #tpu.memory_space<vmem>>, vector<1x128xf32>
    tpu.vector_store %arg4[%90, %c0_24], %89 {strides = array<i32>} : memref<16x128xf32, #tpu.memory_space<vmem>>, vector<1x128xf32>,
    %c13_i32 = arith.constant 13 : i32
    %92 = arith.addi %0, %c13_i32 : i32
    %93 = arith.index_cast %92 : i32 to index
    %94 = memref.load %arg1[%93] : memref<16xi32, #tpu.memory_space<smem>>
    %95 = arith.index_cast %94 : i32 to index
    %c0_25 = arith.constant 0 : index
    %96 = vector.load %arg3[%95, %c0_25] : memref<32x128xf32, #tpu.memory_space<vmem>>, vector<1x128xf32>
    %97 = arith.index_cast %c13_i32 : i32 to index
    %c0_26 = arith.constant 0 : index
    %98 = vector.load %arg4[%97, %c0_26] : memref<16x128xf32, #tpu.memory_space<vmem>>, vector<1x128xf32>
    tpu.vector_store %arg4[%97, %c0_26], %96 {strides = array<i32>} : memref<16x128xf32, #tpu.memory_space<vmem>>, vector<1x128xf32>,
    %c14_i32 = arith.constant 14 : i32
    %99 = arith.addi %0, %c14_i32 : i32
    %100 = arith.index_cast %99 : i32 to index
    %101 = memref.load %arg1[%100] : memref<16xi32, #tpu.memory_space<smem>>
    %102 = arith.index_cast %101 : i32 to index
    %c0_27 = arith.constant 0 : index
    %103 = vector.load %arg3[%102, %c0_27] : memref<32x128xf32, #tpu.memory_space<vmem>>, vector<1x128xf32>
    %104 = arith.index_cast %c14_i32 : i32 to index
    %c0_28 = arith.constant 0 : index
    %105 = vector.load %arg4[%104, %c0_28] : memref<16x128xf32, #tpu.memory_space<vmem>>, vector<1x128xf32>
    tpu.vector_store %arg4[%104, %c0_28], %103 {strides = array<i32>} : memref<16x128xf32, #tpu.memory_space<vmem>>, vector<1x128xf32>,
    %c15_i32 = arith.constant 15 : i32
    %106 = arith.addi %0, %c15_i32 : i32
    %107 = arith.index_cast %106 : i32 to index
    %108 = memref.load %arg1[%107] : memref<16xi32, #tpu.memory_space<smem>>
    %109 = arith.index_cast %108 : i32 to index
    %c0_29 = arith.constant 0 : index
    %110 = vector.load %arg3[%109, %c0_29] : memref<32x128xf32, #tpu.memory_space<vmem>>, vector<1x128xf32>
    %111 = arith.index_cast %c15_i32 : i32 to index
    %c0_30 = arith.constant 0 : index
    %112 = vector.load %arg4[%111, %c0_30] : memref<16x128xf32, #tpu.memory_space<vmem>>, vector<1x128xf32>
    tpu.vector_store %arg4[%111, %c0_30], %110 {strides = array<i32>} : memref<16x128xf32, #tpu.memory_space<vmem>>, vector<1x128xf32>,
    %c16_i32_31 = arith.constant 16 : i32
    return
  }
  func.func @transform_0(%arg0: i32, %arg1: memref<16xi32, #tpu.memory_space<smem>>, %arg2: memref<1xi32, #tpu.memory_space<smem>>) -> (i32, i32) {
    %c0_i32 = arith.constant 0 : i32
    %c0_i32_0 = arith.constant 0 : i32
    %c0_i32_1 = arith.constant 0 : i32
    return %c0_i32, %c0_i32_0 : i32, i32
  }
  func.func @transform_1(%arg0: i32, %arg1: memref<16xi32, #tpu.memory_space<smem>>, %arg2: memref<1xi32, #tpu.memory_space<smem>>) -> (i32, i32) {
    %c0_i32 = arith.constant 0 : i32
    %c0_i32_0 = arith.constant 0 : i32
    return %arg0, %c0_i32 : i32, i32
  }
}

</mosaic_0001>

<bundles_post_ra>
// kernel: tpu_custom_call.1
= control target key start
LH: loop header
LB: loop body
LE: loop exit
PB: predicated region body
PF: predicated region fallthrough
CT: control target
= control target key end

     0   :  { %s297_s0 = inlined_call_operand.vmem [shape: s32[16], index: 0, kind: input, shape index: {}]   ;;  %s298_s1 = inlined_call_operand.<no memory space> [shape: s32[1], index: 1, kind: input, shape index: {}]   ;;  %s299_s2 = inlined_call_operand.hbm [shape: f32[32,128], index: 2, kind: input, shape index: {}]   ;;  %s300_s3 = inlined_call_operand.hbm [shape: f32[16,128], index: 3, kind: output, shape index: {}]  }
   0x1   :  { %s8_s14 = sshll.u32 %s297_s0, 4  ;;  %s9_s14 = int_to_ptr.vmem [resolvable:$true] %s8_s14 }
   0x2   :  { %s165_s15 = scalar_lea.vmem %s9_s14, 16  ;;  %p170_p1 = scmp.lt.s32.totalorder %s9_s14, %s9_s14 }
   0x3   :  { %p166_p0 = scmp.ne.s32.totalorder %s9_s14, %s165_s15  ;;  %p171_p2 = scmp.lt.s32.totalorder %s165_s15, %s165_s15 }
   0x5   :  { %p172_p3 = por %p171_p2, %p170_p1 }
   0x7   :  { %p173_p4 = pnand %p172_p3, %p166_p0 }
   0x9   :  { %176 = shalt.err (!%p173_p4)  }
   0xa   :  { %s227_s16 = smov [#allocation3]  }
   0xb   :  { %11 = dma.vmem_to_smem %s9_s14, 16, %s227_s16, [#allocation2] }
   0xc   :  { %221 = dma.done.wait [#allocation2], 16 }
   0xd   :  { %222 = vsyncadd [#allocation2], 4294967280 }
   0xe   :  { %14 = sfence }
   0xf   :  { %15 = vsyncpa [#allocation6], 0 }
  0x10   :  { %16 = vsyncpa [#allocation7], 0  ;;  %s228_s1 = smov [#allocation5]   ;;  %s177_s19 = scalar_lea.hbm %s299_s2, 512 }
  0x11   :  { %s22_s17 = sshll.u32 %s228_s1, 4  ;;  %p178_p5 = scmp.ne.s32.totalorder %s299_s2, %s177_s19  ;;  %s23_s17 = int_to_ptr.vmem [resolvable:$true] %s22_s17 }
  0x12   :  { %p181_p6 = scmp.lt.u32.totalorder %s177_s19, %s299_s2 }
  0x14   :  { %p183_p7 = pnand %p181_p6, %p178_p5 }
  0x16   :  { %186 = shalt.err (!%p183_p7)
}
  0x17   :  { %s187_s24 = scalar_lea.vmem %s23_s17, 512  ;;  %p192_p9 = scmp.lt.s32.totalorder %s23_s17, %s23_s17 }
  0x18   :  { %p188_p8 = scmp.ne.s32.totalorder %s23_s17, %s187_s24  ;;  %p193_p10 = scmp.lt.s32.totalorder %s187_s24, %s187_s24 }
  0x1a   :  { %p194_p11 = por %p193_p10, %p192_p9 }
  0x1c   :  { %p195_p12 = pnand %p194_p11, %p188_p8 }
  0x1e   :  { %198 = shalt.err (!%p195_p12)
}
  0x1f   :  { %s229_s25 = smov 128   ;;  %s230_s26 = smov 8  }
  0x20   :  { %28 = dma.hbm_to_vmem [thread:$0]  %s299_s2, 512, %s23_s17, [#allocation6], %s229_s25, %s229_s25, %s230_s26  }
  0x21   :  { %223 = dma.done.wait [#allocation6], 512  }
  0x22   :  { %224 = vsyncadd [#allocation6], 4294966784  ;;  %s33_s29 = sld [smem:[#allocation3]]  ;;  %s145_s30 = sld [smem:[#allocation3 + $0x1]] }
  0x23   :  { %s146_s4 = sld [smem:[#allocation3 + $0x2]]  ;;  %s147_s5 = sld [smem:[#allocation3 + $0x3]] }
  0x24   :  { %s148_s6 = sld [smem:[#allocation3 + $0x4]]  ;;  %s149_s7 = sld [smem:[#allocation3 + $0x5]] }
  0x25   :  { %s150_s8 = sld [smem:[#allocation3 + $0x6]]  ;;  %s151_s9 = sld [smem:[#allocation3 + $0x7]] }
  0x26   :  { %s270_s10 = sld [smem:[#allocation3 + $0x8]]  ;;  %s272_s11 = sld [smem:[#allocation3 + $0x9]] }
  0x27   :  { %s274_s12 = sld [smem:[#allocation3 + $0xa]]  ;;  %s276_s13 = sld [smem:[#allocation3 + $0xb]] }
  0x28   :  { %s34_s14 = scalar_lea.vmem [#allocation5], %s33_s29  ;;  %s39_s2 = scalar_lea.vmem [#allocation5], %s145_s30 }
  0x29   :  { %v35_v0 = vld [vmem:[%s34_s14] sm:$0x1]  ;;  %s44_s15 = scalar_lea.vmem [#allocation5], %s146_s4  ;;  %s49_s16 = scalar_lea.vmem [#allocation5], %s147_s5 }
  0x2a   :  { %v40_v1 = vld [vmem:[%s39_s2] sm:$0x1]  ;;  %36 = vst [vmem:[#allocation8] sm:$0x1] %v35_v0  ;;  %s54_s1 = scalar_lea.vmem [#allocation5], %s148_s6  ;;  %s59_s17 = scalar_lea.vmem [#allocation5], %s149_s7 }
  0x2b   :  { %41 = vst [vmem:[#allocation8 + $0x1] sm:$0x1] %v40_v1  ;;  %v45_v2 = vld [vmem:[%s44_s15] sm:$0x1]  ;;  %s64_s18 = scalar_lea.vmem [#allocation5], %s150_s8  ;;  %s69_s0 = scalar_lea.vmem [#allocation5], %s151_s9 }
  0x2c   :  { %v50_v3 = vld [vmem:[%s49_s16] sm:$0x1]  ;;  %46 = vst [vmem:[#allocation8 + $0x2] sm:$0x1] %v45_v2  ;;  %s74_s19 = scalar_lea.vmem [#allocation5], %s270_s10  ;;  %s79_s20 = scalar_lea.vmem [#allocation5], %s272_s11 }
  0x2d   :  { %51 = vst [vmem:[#allocation8 + $0x3] sm:$0x1] %v50_v3  ;;  %v55_v4 = vld [vmem:[%s54_s1] sm:$0x1]  ;;  %s84_s21 = scalar_lea.vmem [#allocation5], %s274_s12  ;;  %s89_s22 = scalar_lea.vmem [#allocation5], %s276_s13 }
  0x2e   :  { %v60_v5 = vld [vmem:[%s59_s17] sm:$0x1]  ;;  %56 = vst [vmem:[#allocation8 + $0x4] sm:$0x1] %v55_v4  ;;  %s156_s23 = sld [smem:[#allocation3 + $0xc]]  ;;  %s157_s24 = sld [smem:[#allocation3 + $0xd]] }
  0x2f   :  { %61 = vst [vmem:[#allocation8 + $0x5] sm:$0x1] %v60_v5  ;;  %v65_v6 = vld [vmem:[%s64_s18] sm:$0x1]  ;;  %s158_s27 = sld [smem:[#allocation3 + $0xe]]  ;;  %s159_s28 = sld [smem:[#allocation3 + $0xf]] }
  0x30   :  { %v70_v7 = vld [vmem:[%s69_s0] sm:$0x1]  ;;  %66 = vst [vmem:[#allocation8 + $0x6] sm:$0x1] %v65_v6  ;;  %s231_s29 = smov [#allocation8]  }
  0x31   :  { %71 = vst [vmem:[#allocation8 + $0x7] sm:$0x1] %v70_v7  ;;  %v75_v8 = vld [vmem:[%s74_s19] sm:$0x1]  ;;  %s117_s30 = sshll.u32 %s231_s29, 4  ;;  %s118_s30 = int_to_ptr.vmem [resolvable:$true] %s117_s30 }
  0x32   :  { %v80_v9 = vld [vmem:[%s79_s20] sm:$0x1]  ;;  %76 = vst [vmem:[#allocation8 + $0x8] sm:$0x1] %v75_v8  ;;  %s199_s8 = scalar_lea.vmem %s118_s30, 256  ;;  %p204_p0 = scmp.lt.s32.totalorder %s118_s30, %s118_s30 }
  0x33   :  { %81 = vst [vmem:[#allocation8 + $0x9] sm:$0x1] %v80_v9  ;;  %v85_v10 = vld [vmem:[%s84_s21] sm:$0x1]  ;;  %p200_p13 = scmp.ne.s32.totalorder %s118_s30, %s199_s8  ;;  %p205_p1 = scmp.lt.s32.totalorder %s199_s8, %s199_s8 }
  0x34   :  { %v90_v11 = vld [vmem:[%s89_s22] sm:$0x1]  ;;  %86 = vst [vmem:[#allocation8 + $0xa] sm:$0x1] %v85_v10  ;;  %s94_s4 = scalar_lea.vmem [#allocation5], %s156_s23  ;;  %s99_s5 = scalar_lea.vmem [#allocation5], %s157_s24 }
  0x35   :  { %91 = vst [vmem:[#allocation8 + $0xb] sm:$0x1] %v90_v11  ;;  %v95_v12 = vld [vmem:[%s94_s4] sm:$0x1]  ;;  %s104_s6 = scalar_lea.vmem [#allocation5], %s158_s27  ;;  %s109_s7 = scalar_lea.vmem [#allocation5], %s159_s28 }
  0x36   :  { %96 = vst [vmem:[#allocation8 + $0xc] sm:$0x1] %v95_v12  ;;  %v100_v13 = vld [vmem:[%s99_s5] sm:$0x1]  ;;  %p206_p2 = por %p205_p1, %p204_p0 }
  0x37   :  { %v105_v14 = vld [vmem:[%s104_s6] sm:$0x1]  ;;  %101 = vst [vmem:[#allocation8 + $0xd] sm:$0x1] %v100_v13 }
  0x38   :  { %106 = vst [vmem:[#allocation8 + $0xe] sm:$0x1] %v105_v14  ;;  %v110_v15 = vld [vmem:[%s109_s7] sm:$0x1]  ;;  %p207_p3 = pnand %p206_p2, %p200_p13 }
  0x39   :  { %111 = vst [vmem:[#allocation8 + $0xf] sm:$0x1] %v110_v15 }
  0x3a   :  { %210 = shalt.err (!%p207_p3)
}
  0x3b   :  { %s211_s11 = scalar_lea.hbm %s300_s3, 256 }
  0x3c   :  { %p212_p4 = scmp.ne.s32.totalorder %s300_s3, %s211_s11  ;;  %p215_p5 = scmp.lt.u32.totalorder %s211_s11, %s300_s3 }
  0x3e   :  { %p217_p6 = pnand %p215_p5, %p212_p4 }
  0x40   :  { %220 = shalt.err (!%p217_p6)
}
  0x41   :  { %123 = dma.vmem_to_hbm [thread:$0]  %s118_s30, 256, %s300_s3, [#allocation7], %s229_s25, %s229_s25, %s230_s26  }
  0x42   :  { %225 = dma.done.wait [#allocation7], 256  }
  0x43   :  { %226 = vsyncadd [#allocation7], 4294967040 }
  0x44   :  { %127 = vsyncpa [#allocation6], 1 }
  0x45   :  { %128 = vsyncpa [#allocation7], 1 }

</bundles_post_ra>
